<compile_context>
chip_gen: v6e
topology: v6e:2x2x1
jax: 0.10.0
libtpu: 0.0.40
codegen_flags: <defaults>
</compile_context>

<pallas_src>
import functools

import jax
import jax.numpy as jnp
from jax.experimental import pallas as pl
from jax.experimental.pallas import tpu as pltpu


def _bn_kernel(x_ref, gamma_ref, beta_ref,                 # inputs
               y_ref, mean_ref, var_ref,                   # outputs
               sum_ref, sq_ref, m0_ref, scale_ref, shift_ref,  # VMEM scratch
               *, eps, inv_m, pad_count, inv_b0):
    """Grid = (c_tile, pass, n_tile); pass 0 = stats, pass 1 = normalize."""
    p = pl.program_id(1)
    n = pl.program_id(2)
    last_n = pl.num_programs(2) - 1

    @pl.when(p == 0)
    def _stats_pass():
        x = x_ref[...].astype(jnp.float32)               # (TN, TC, HWp)

        @pl.when(n == 0)
        def _init():
            # Shift point m0 = mean of the first block (including any zero
            # padding - any per-channel shift is valid; this one is close to
            # the true mean, which removes the E[x^2]-E[x]^2 cancellation).
            m0_ref[...] = jnp.sum(x, axis=(0, 2), keepdims=True) * inv_b0
            sum_ref[...] = jnp.zeros_like(sum_ref)
            sq_ref[...] = jnp.zeros_like(sq_ref)

        xc = x - m0_ref[...]
        sum_ref[...] += jnp.sum(xc, axis=(0, 2), keepdims=True)
        sq_ref[...] += jnp.sum(xc * xc, axis=(0, 2), keepdims=True)

        @pl.when(n == last_n)
        def _finalize():
            m0 = m0_ref[...]
            # Remove the contribution of the zero-padded elements: each padded
            # element added (0 - m0) to the sum and m0^2 to the sum of squares.
            s = sum_ref[...] + pad_count * m0
            q = sq_ref[...] - pad_count * (m0 * m0)
            d = s * inv_m
            mean = m0 + d
            var = jnp.maximum(q * inv_m - d * d, 0.0)
            inv_std = jax.lax.rsqrt(var + eps)
            scale = gamma_ref[...].astype(jnp.float32) * inv_std
            shift = beta_ref[...].astype(jnp.float32) - mean * scale
            mean_ref[...] = mean
            var_ref[...] = var
            scale_ref[...] = scale.astype(scale_ref.dtype)
            shift_ref[...] = shift.astype(shift_ref.dtype)

    @pl.when(p == 1)
    def _normalize_pass():
        # Fused scale/shift; runs in bf16 when the input is bf16 (scale/shift
        # scratch were stored in the apply dtype), otherwise in f32.
        y_ref[...] = (x_ref[...] * scale_ref[...] + shift_ref[...]).astype(y_ref.dtype)


def _vmem_budget_bytes():
    """Per-core VMEM budget with headroom (never the full physical capacity)."""
    cap = 64 << 20                              # safe default (v7x per-TensorCore)
    try:
        kind = jax.devices()[0].device_kind.lower()
        if any(t in kind for t in ("v5 lite", "v5e", "v5litepod", "v6")):
            cap = 128 << 20                     # v5e / v6e have 128 MiB VMEM
    except Exception:
        pass
    try:
        info = pltpu.get_tpu_info()
        reported = int(getattr(info, "vmem_capacity_bytes", 0) or 0)
        if reported > 0:
            cap = min(cap, reported)
    except Exception:
        pass
    # ~15% headroom for compiler internal scratch / semaphores / stat buffers.
    return min(int(cap * 0.85), 112 << 20)


def _choose_tc(C):
    """Channel tile: multiple-of-8 divisor of C, <= 128, preferring >= 2 tiles."""
    divs8 = [d for d in range(8, C + 1, 8) if C % d == 0]
    if not divs8:
        return C                                # small / odd C: whole channel dim
    two_tile = [d for d in divs8 if C // d >= 2]
    pool = two_tile if two_tile else divs8
    capped = [d for d in pool if d <= 128]
    return max(capped) if capped else min(pool)


def my_batchnorm2d_forward(x, gamma, beta, eps=1e-5):
    """x: (N, C, H, W); gamma/beta broadcastable to (1, C, 1, 1).

    Returns (x_hat, mean, var) with shapes (N,C,H,W), (1,C,1,1), (1,C,1,1),
    matching mbn2.forward (biased variance, training mode).
    """
    N, C, H, W = x.shape
    HW = H * W
    M = N * HW                                   # true element count per channel
    itemsize = x.dtype.itemsize

    # Free views -- no data movement (NCHW is already contiguous as (N, C, HW)).
    x3 = x.reshape(N, C, HW)
    g3 = jnp.asarray(gamma, jnp.float32).reshape(1, C, 1)
    b3 = jnp.asarray(beta, jnp.float32).reshape(1, C, 1)

    # Lane-dense spatial axis: pad to a multiple of 128 so y stores are unmasked.
    HWp = -(-HW // 128) * 128

    # Generation-aware block sizing: working set ~= 4 x block (x, y double-buffered).
    vmem_budget = _vmem_budget_bytes()
    blk_target = max(1 << 20, (vmem_budget - (2 << 20)) // 4)

    TC = _choose_tc(C)
    nc = C // TC

    # Batch tile: prefer TN == N (single read of x: pass-1 block index == pass-0's).
    row_bytes = TC * HWp * itemsize
    if N * row_bytes <= blk_target:
        TN, Np = N, N
    else:
        cap = int(min(max(1, blk_target // row_bytes), N))
        tn_div = 1
        for d in range(cap, 0, -1):
            if N % d == 0:
                tn_div = d
                break
        if 2 * tn_div >= cap:
            TN, Np = tn_div, N                   # good-enough divisor: no batch pad
        else:
            TN = cap                             # pad batch; zeros don't hurt stats
            Np = -(-N // TN) * TN
    nn = Np // TN

    if (Np, HWp) != (N, HW):
        x3 = jnp.pad(x3, ((0, Np - N), (0, 0), (0, HWp - HW)))

    pad_count = float(Np * HWp - M)              # zero-padded elems per channel
    blk_bytes = TN * TC * HWp * itemsize
    vmem_limit = int(min(max(vmem_budget, 4 * blk_bytes + (4 << 20)), 128 << 20))

    # bf16 apply path (bf16 VALU on v6e/v7x; still correct elsewhere).
    apply_dtype = x.dtype if x.dtype == jnp.dtype(jnp.bfloat16) else jnp.float32

    kernel = functools.partial(
        _bn_kernel,
        eps=float(eps),
        inv_m=1.0 / float(M),
        pad_count=pad_count,
        inv_b0=1.0 / float(TN * HWp),
    )

    cost = pl.CostEstimate(
        flops=int(7 * C * M),
        transcendentals=int(C),
        bytes_accessed=int((2 + (1 if nn > 1 else 0)) * C * M * itemsize + 6 * C * 4),
    )

    stat_spec = pl.BlockSpec((1, TC, 1), lambda c, p, n: (0, c, 0))

    y3, mean3, var3 = pl.pallas_call(
        kernel,
        out_shape=(
            jax.ShapeDtypeStruct((Np, C, HWp), x.dtype),
            jax.ShapeDtypeStruct((1, C, 1), jnp.float32),
            jax.ShapeDtypeStruct((1, C, 1), jnp.float32),
        ),
        grid_spec=pltpu.PrefetchScalarGridSpec(
            num_scalar_prefetch=0,
            grid=(nc, 2, nn),
            in_specs=[
                pl.BlockSpec((TN, TC, HWp), lambda c, p, n: (n, c, 0)),
                stat_spec,   # gamma
                stat_spec,   # beta
            ],
            out_specs=(
                # Frozen at (0, c, 0) while p == 0 (stats pass) so the unwritten
                # buffer is never flushed (relies on write-back happening only on
                # block-index change); tracks n during the normalize pass.
                pl.BlockSpec((TN, TC, HWp), lambda c, p, n: (n * p, c, 0)),
                stat_spec,   # mean
                stat_spec,   # var
            ),
            scratch_shapes=[
                pltpu.VMEM((1, TC, 1), jnp.float32),   # shifted sum
                pltpu.VMEM((1, TC, 1), jnp.float32),   # shifted sum of squares
                pltpu.VMEM((1, TC, 1), jnp.float32),   # shift point m0
                pltpu.VMEM((1, TC, 1), apply_dtype),   # scale
                pltpu.VMEM((1, TC, 1), apply_dtype),   # shift
            ],
        ),
        compiler_params=pltpu.CompilerParams(
            dimension_semantics=("parallel", "arbitrary", "arbitrary"),
            vmem_limit_bytes=vmem_limit,
        ),
        cost_estimate=cost,
    )(x3, g3, b3)

    if (Np, HWp) != (N, HW):
        y3 = y3[:N, :, :HW]

    return (y3.reshape(N, C, H, W),
            mean3.reshape(1, C, 1, 1),
            var3.reshape(1, C, 1, 1))


class MyBatchNorm2dJax:
    """JAX mirror of the PyTorch MyBatchNorm2d (forward only, training mode)."""

    def __init__(self, num_features, eps=1e-5, momentum=0.9, affine=True):
        self.affine = affine
        self.eps = eps
        self.momentum = momentum
        # reset_parameters(): gamma = ones, beta = zeros (mirrors the module,
        # including its running_var ending up zero-initialized).
        self.gamma = jnp.ones((1, num_features, 1, 1), jnp.float32)
        self.beta = jnp.zeros((1, num_features, 1, 1), jnp.float32)
        self.running_mean = jnp.zeros((1, num_features, 1, 1), jnp.float32)
        self.running_var = jnp.zeros((1, num_features, 1, 1), jnp.float32)

    def __call__(self, x):
        x_hat, mean, var = my_batchnorm2d_forward(x, self.gamma, self.beta, self.eps)
        self.running_var = self.momentum * self.running_var + (1 - self.momentum) * var
        self.running_mean = self.momentum * self.running_mean + (1 - self.momentum) * mean
        return x_hat


if __name__ == "__main__":
    key = jax.random.PRNGKey(0)
    N, C, H, W = 2, 4, 16, 16
    x = jax.random.normal(key, (N, C, H, W), dtype=jnp.float32)

    bn = MyBatchNorm2dJax(num_features=C, eps=1e-5, momentum=0.9, affine=True)
    y = jax.block_until_ready(bn(x))

    # Pure-JAX reference (same semantics as mbn2.forward).
    ref_mean = jnp.mean(x, axis=(0, 2, 3), keepdims=True)
    ref_var = jnp.mean((x - ref_mean) ** 2, axis=(0, 2, 3), keepdims=True)
    ref_y = bn.gamma * (x - ref_mean) / jnp.sqrt(ref_var + bn.eps) + bn.beta

    assert y.shape == (N, C, H, W)
    assert jnp.allclose(y, ref_y, atol=1e-5, rtol=1e-5)

    _, mean, var = my_batchnorm2d_forward(x, bn.gamma, bn.beta, bn.eps)
    mean, var = jax.block_until_ready((mean, var))
    assert jnp.allclose(mean, ref_mean, atol=1e-6, rtol=1e-6)
    assert jnp.allclose(var, ref_var, atol=1e-5, rtol=1e-5)

    print("KERNEL_OK")
</pallas_src>

<mosaic_0001>
module attributes {stable_mosaic.version = 11 : i64} {
  func.func @_bn_kernel(%arg0: i32, %arg1: i32, %arg2: i32, %arg3: memref<2x4x256xf32, #tpu.memory_space<vmem>>, %arg4: memref<1x4x1xf32, #tpu.memory_space<vmem>>, %arg5: memref<1x4x1xf32, #tpu.memory_space<vmem>>, %arg6: memref<2x4x256xf32, #tpu.memory_space<vmem>>, %arg7: memref<1x4x1xf32, #tpu.memory_space<vmem>>, %arg8: memref<1x4x1xf32, #tpu.memory_space<vmem>>, %arg9: memref<1x4x1xf32, #tpu.memory_space<vmem>>, %arg10: memref<1x4x1xf32, #tpu.memory_space<vmem>>, %arg11: memref<1x4x1xf32, #tpu.memory_space<vmem>>, %arg12: memref<1x4x1xf32, #tpu.memory_space<vmem>>, %arg13: memref<1x4x1xf32, #tpu.memory_space<vmem>>) attributes {dimension_semantics = [#tpu.dimension_semantics<parallel>, #tpu.dimension_semantics<arbitrary>, #tpu.dimension_semantics<arbitrary>], iteration_bounds = array<i64: 1, 2, 1>, scalar_prefetch = 0 : i64, scratch_operands = 5 : i64, tpu.core_type = #tpu.core_type<tc>, window_params = [{transform_indices = @transform_0, window_bounds = array<i64: 2, 4, 256>}, {transform_indices = @transform_1, window_bounds = array<i64: 1, 4, 1>}, {transform_indices = @transform_2, window_bounds = array<i64: 1, 4, 1>}, {transform_indices = @transform_3, window_bounds = array<i64: 2, 4, 256>}, {transform_indices = @transform_4, window_bounds = array<i64: 1, 4, 1>}, {transform_indices = @transform_5, window_bounds = array<i64: 1, 4, 1>}]} {
    %c0_i32 = arith.constant 0 : i32
    %0 = arith.cmpi eq, %arg1, %c0_i32 : i32
    %1 = arith.extui %0 : i1 to i32
    %c0_i32_0 = arith.constant 0 : i32
    %2 = arith.cmpi ne, %1, %c0_i32_0 : i32
    scf.if %2 {
      %c0 = arith.constant 0 : index
      %c0_2 = arith.constant 0 : index
      %c0_3 = arith.constant 0 : index
      %6 = vector.load %arg3[%c0, %c0_2, %c0_3] : memref<2x4x256xf32, #tpu.memory_space<vmem>>, vector<2x4x256xf32>
      %c0_i32_4 = arith.constant 0 : i32
      %7 = arith.cmpi eq, %arg2, %c0_i32_4 : i32
      %8 = arith.extui %7 : i1 to i32
      %c0_i32_5 = arith.constant 0 : i32
      %9 = arith.cmpi ne, %8, %c0_i32_5 : i32
      scf.if %9 {
        %cst_24 = arith.constant dense<0.000000e+00> : vector<4xf32>
        %27 = vector.multi_reduction <add>, %6, %cst_24 [0, 2] : vector<2x4x256xf32> to vector<4xf32>
        %28 = vector.shape_cast %27 : vector<4xf32> to vector<1x4x1xf32>
        %cst_25 = arith.constant 0.001953125 : f32
        %29 = vector.broadcast %cst_25 : f32 to vector<1x4x1xf32>
        %30 = arith.mulf %28, %29 : vector<1x4x1xf32>
        %c0_26 = arith.constant 0 : index
        %c0_27 = arith.constant 0 : index
        %c0_28 = arith.constant 0 : index
        %31 = vector.load %arg11[%c0_26, %c0_27, %c0_28] : memref<1x4x1xf32, #tpu.memory_space<vmem>>, vector<1x4x1xf32>
        tpu.vector_store %arg11[%c0_26, %c0_27, %c0_28], %30 {strides = array<i32>} : memref<1x4x1xf32, #tpu.memory_space<vmem>>, vector<1x4x1xf32>,
        %cst_29 = arith.constant 0.000000e+00 : f32
        %32 = vector.broadcast %cst_29 : f32 to vector<1x4x1xf32>
        %c0_30 = arith.constant 0 : index
        %c0_31 = arith.constant 0 : index
        %c0_32 = arith.constant 0 : index
        %33 = vector.load %arg9[%c0_30, %c0_31, %c0_32] : memref<1x4x1xf32, #tpu.memory_space<vmem>>, vector<1x4x1xf32>
        tpu.vector_store %arg9[%c0_30, %c0_31, %c0_32], %32 {strides = array<i32>} : memref<1x4x1xf32, #tpu.memory_space<vmem>>, vector<1x4x1xf32>,
        %cst_33 = arith.constant 0.000000e+00 : f32
        %34 = vector.broadcast %cst_33 : f32 to vector<1x4x1xf32>
        %c0_34 = arith.constant 0 : index
        %c0_35 = arith.constant 0 : index
        %c0_36 = arith.constant 0 : index
        %35 = vector.load %arg10[%c0_34, %c0_35, %c0_36] : memref<1x4x1xf32, #tpu.memory_space<vmem>>, vector<1x4x1xf32>
        tpu.vector_store %arg10[%c0_34, %c0_35, %c0_36], %34 {strides = array<i32>} : memref<1x4x1xf32, #tpu.memory_space<vmem>>, vector<1x4x1xf32>,
      } else {
      }
      %c0_6 = arith.constant 0 : index
      %c0_7 = arith.constant 0 : index
      %c0_8 = arith.constant 0 : index
      %10 = vector.load %arg11[%c0_6, %c0_7, %c0_8] : memref<1x4x1xf32, #tpu.memory_space<vmem>>, vector<1x4x1xf32>
      %11 = vector.broadcast %10 : vector<1x4x1xf32> to vector<2x4x256xf32>
      %12 = arith.subf %6, %11 : vector<2x4x256xf32>
      %c0_9 = arith.constant 0 : index
      %c0_10 = arith.constant 0 : index
      %c0_11 = arith.constant 0 : index
      %13 = vector.load %arg9[%c0_9, %c0_10, %c0_11] : memref<1x4x1xf32, #tpu.memory_space<vmem>>, vector<1x4x1xf32>
      %cst = arith.constant dense<0.000000e+00> : vector<4xf32>
      %14 = vector.multi_reduction <add>, %12, %cst [0, 2] : vector<2x4x256xf32> to vector<4xf32>
      %15 = vector.shape_cast %14 : vector<4xf32> to vector<1x4x1xf32>
      %16 = arith.addf %13, %15 : vector<1x4x1xf32>
      %c0_12 = arith.constant 0 : index
      %c0_13 = arith.constant 0 : index
      %c0_14 = arith.constant 0 : index
      %17 = vector.load %arg9[%c0_12, %c0_13, %c0_14] : memref<1x4x1xf32, #tpu.memory_space<vmem>>, vector<1x4x1xf32>
      tpu.vector_store %arg9[%c0_12, %c0_13, %c0_14], %16 {strides = array<i32>} : memref<1x4x1xf32, #tpu.memory_space<vmem>>, vector<1x4x1xf32>,
      %c0_15 = arith.constant 0 : index
      %c0_16 = arith.constant 0 : index
      %c0_17 = arith.constant 0 : index
      %18 = vector.load %arg10[%c0_15, %c0_16, %c0_17] : memref<1x4x1xf32, #tpu.memory_space<vmem>>, vector<1x4x1xf32>
      %19 = arith.mulf %12, %12 : vector<2x4x256xf32>
      %cst_18 = arith.constant dense<0.000000e+00> : vector<4xf32>
      %20 = vector.multi_reduction <add>, %19, %cst_18 [0, 2] : vector<2x4x256xf32> to vector<4xf32>
      %21 = vector.shape_cast %20 : vector<4xf32> to vector<1x4x1xf32>
      %22 = arith.addf %18, %21 : vector<1x4x1xf32>
      %c0_19 = arith.constant 0 : index
      %c0_20 = arith.constant 0 : index
      %c0_21 = arith.constant 0 : index
      %23 = vector.load %arg10[%c0_19, %c0_20, %c0_21] : memref<1x4x1xf32, #tpu.memory_space<vmem>>, vector<1x4x1xf32>
      tpu.vector_store %arg10[%c0_19, %c0_20, %c0_21], %22 {strides = array<i32>} : memref<1x4x1xf32, #tpu.memory_space<vmem>>, vector<1x4x1xf32>,
      %c0_i32_22 = arith.constant 0 : i32
      %24 = arith.cmpi eq, %arg2, %c0_i32_22 : i32
      %25 = arith.extui %24 : i1 to i32
      %c0_i32_23 = arith.constant 0 : i32
      %26 = arith.cmpi ne, %25, %c0_i32_23 : i32
      scf.if %26 {
        %c0_24 = arith.constant 0 : index
        %c0_25 = arith.constant 0 : index
        %c0_26 = arith.constant 0 : index
        %27 = vector.load %arg11[%c0_24, %c0_25, %c0_26] : memref<1x4x1xf32, #tpu.memory_space<vmem>>, vector<1x4x1xf32>
        %c0_27 = arith.constant 0 : index
        %c0_28 = arith.constant 0 : index
        %c0_29 = arith.constant 0 : index
        %28 = vector.load %arg9[%c0_27, %c0_28, %c0_29] : memref<1x4x1xf32, #tpu.memory_space<vmem>>, vector<1x4x1xf32>
        %cst_30 = arith.constant 0.000000e+00 : f32
        %29 = vector.broadcast %cst_30 : f32 to vector<1x4x1xf32>
        %30 = arith.mulf %29, %27 : vector<1x4x1xf32>
        %31 = arith.addf %28, %30 : vector<1x4x1xf32>
        %c0_31 = arith.constant 0 : index
        %c0_32 = arith.constant 0 : index
        %c0_33 = arith.constant 0 : index
        %32 = vector.load %arg10[%c0_31, %c0_32, %c0_33] : memref<1x4x1xf32, #tpu.memory_space<vmem>>, vector<1x4x1xf32>
        %33 = arith.mulf %27, %27 : vector<1x4x1xf32>
        %cst_34 = arith.constant 0.000000e+00 : f32
        %34 = vector.broadcast %cst_34 : f32 to vector<1x4x1xf32>
        %35 = arith.mulf %34, %33 : vector<1x4x1xf32>
        %36 = arith.subf %32, %35 : vector<1x4x1xf32>
        %cst_35 = arith.constant 0.001953125 : f32
        %37 = vector.broadcast %cst_35 : f32 to vector<1x4x1xf32>
        %38 = arith.mulf %31, %37 : vector<1x4x1xf32>
        %39 = arith.addf %27, %38 : vector<1x4x1xf32>
        %cst_36 = arith.constant 0.001953125 : f32
        %40 = vector.broadcast %cst_36 : f32 to vector<1x4x1xf32>
        %41 = arith.mulf %36, %40 : vector<1x4x1xf32>
        %42 = arith.mulf %38, %38 : vector<1x4x1xf32>
        %43 = arith.subf %41, %42 : vector<1x4x1xf32>
        %cst_37 = arith.constant 0.000000e+00 : f32
        %44 = vector.broadcast %cst_37 : f32 to vector<1x4x1xf32>
        %45 = arith.maximumf %43, %44 : vector<1x4x1xf32>
        %cst_38 = arith.constant 9.99999974E-6 : f32
        %46 = vector.broadcast %cst_38 : f32 to vector<1x4x1xf32>
        %47 = arith.addf %45, %46 : vector<1x4x1xf32>
        %48 = math.rsqrt %47 : vector<1x4x1xf32>
        %c0_39 = arith.constant 0 : index
        %c0_40 = arith.constant 0 : index
        %c0_41 = arith.constant 0 : index
        %49 = vector.load %arg4[%c0_39, %c0_40, %c0_41] : memref<1x4x1xf32, #tpu.memory_space<vmem>>, vector<1x4x1xf32>
        %50 = arith.mulf %49, %48 : vector<1x4x1xf32>
        %c0_42 = arith.constant 0 : index
        %c0_43 = arith.constant 0 : index
        %c0_44 = arith.constant 0 : index
        %51 = vector.load %arg5[%c0_42, %c0_43, %c0_44] : memref<1x4x1xf32, #tpu.memory_space<vmem>>, vector<1x4x1xf32>
        %52 = arith.mulf %39, %50 : vector<1x4x1xf32>
        %53 = arith.subf %51, %52 : vector<1x4x1xf32>
        %c0_45 = arith.constant 0 : index
        %c0_46 = arith.constant 0 : index
        %c0_47 = arith.constant 0 : index
        %54 = vector.load %arg7[%c0_45, %c0_46, %c0_47] : memref<1x4x1xf32, #tpu.memory_space<vmem>>, vector<1x4x1xf32>
        tpu.vector_store %arg7[%c0_45, %c0_46, %c0_47], %39 {strides = array<i32>} : memref<1x4x1xf32, #tpu.memory_space<vmem>>, vector<1x4x1xf32>,
        %c0_48 = arith.constant 0 : index
        %c0_49 = arith.constant 0 : index
        %c0_50 = arith.constant 0 : index
        %55 = vector.load %arg8[%c0_48, %c0_49, %c0_50] : memref<1x4x1xf32, #tpu.memory_space<vmem>>, vector<1x4x1xf32>
        tpu.vector_store %arg8[%c0_48, %c0_49, %c0_50], %45 {strides = array<i32>} : memref<1x4x1xf32, #tpu.memory_space<vmem>>, vector<1x4x1xf32>,
        %c0_51 = arith.constant 0 : index
        %c0_52 = arith.constant 0 : index
        %c0_53 = arith.constant 0 : index
        %56 = vector.load %arg12[%c0_51, %c0_52, %c0_53] : memref<1x4x1xf32, #tpu.memory_space<vmem>>, vector<1x4x1xf32>
        tpu.vector_store %arg12[%c0_51, %c0_52, %c0_53], %50 {strides = array<i32>} : memref<1x4x1xf32, #tpu.memory_space<vmem>>, vector<1x4x1xf32>,
        %c0_54 = arith.constant 0 : index
        %c0_55 = arith.constant 0 : index
        %c0_56 = arith.constant 0 : index
        %57 = vector.load %arg13[%c0_54, %c0_55, %c0_56] : memref<1x4x1xf32, #tpu.memory_space<vmem>>, vector<1x4x1xf32>
        tpu.vector_store %arg13[%c0_54, %c0_55, %c0_56], %53 {strides = array<i32>} : memref<1x4x1xf32, #tpu.memory_space<vmem>>, vector<1x4x1xf32>,
      } else {
      }
    } else {
    }
    %c1_i32 = arith.constant 1 : i32
    %3 = arith.cmpi eq, %arg1, %c1_i32 : i32
    %4 = arith.extui %3 : i1 to i32
    %c0_i32_1 = arith.constant 0 : i32
    %5 = arith.cmpi ne, %4, %c0_i32_1 : i32
    scf.if %5 {
      %c0 = arith.constant 0 : index
      %c0_2 = arith.constant 0 : index
      %c0_3 = arith.constant 0 : index
      %6 = vector.load %arg3[%c0, %c0_2, %c0_3] : memref<2x4x256xf32, #tpu.memory_space<vmem>>, vector<2x4x256xf32>
      %c0_4 = arith.constant 0 : index
      %c0_5 = arith.constant 0 : index
      %c0_6 = arith.constant 0 : index
      %7 = vector.load %arg12[%c0_4, %c0_5, %c0_6] : memref<1x4x1xf32, #tpu.memory_space<vmem>>, vector<1x4x1xf32>
      %8 = vector.broadcast %7 : vector<1x4x1xf32> to vector<2x4x256xf32>
      %9 = arith.mulf %6, %8 : vector<2x4x256xf32>
      %c0_7 = arith.constant 0 : index
      %c0_8 = arith.constant 0 : index
      %c0_9 = arith.constant 0 : index
      %10 = vector.load %arg13[%c0_7, %c0_8, %c0_9] : memref<1x4x1xf32, #tpu.memory_space<vmem>>, vector<1x4x1xf32>
      %11 = vector.broadcast %10 : vector<1x4x1xf32> to vector<2x4x256xf32>
      %12 = arith.addf %9, %11 : vector<2x4x256xf32>
      %c0_10 = arith.constant 0 : index
      %c0_11 = arith.constant 0 : index
      %c0_12 = arith.constant 0 : index
      %13 = vector.load %arg6[%c0_10, %c0_11, %c0_12] : memref<2x4x256xf32, #tpu.memory_space<vmem>>, vector<2x4x256xf32>
      tpu.vector_store %arg6[%c0_10, %c0_11, %c0_12], %12 {strides = array<i32>} : memref<2x4x256xf32, #tpu.memory_space<vmem>>, vector<2x4x256xf32>,
    } else {
    }
    return
  }
  func.func @transform_0(%arg0: i32, %arg1: i32, %arg2: i32) -> (i32, i32, i32) {
    %c0_i32 = arith.constant 0 : i32
    %c0_i32_0 = arith.constant 0 : i32
    return %arg2, %arg0, %c0_i32 : i32, i32, i32
  }
  func.func @transform_1(%arg0: i32, %arg1: i32, %arg2: i32) -> (i32, i32, i32) {
    %c0_i32 = arith.constant 0 : i32
    %c0_i32_0 = arith.constant 0 : i32
    %c0_i32_1 = arith.constant 0 : i32
    return %c0_i32, %arg0, %c0_i32_0 : i32, i32, i32
  }
  func.func @transform_2(%arg0: i32, %arg1: i32, %arg2: i32) -> (i32, i32, i32) {
    %c0_i32 = arith.constant 0 : i32
    %c0_i32_0 = arith.constant 0 : i32
    %c0_i32_1 = arith.constant 0 : i32
    return %c0_i32, %arg0, %c0_i32_0 : i32, i32, i32
  }
  func.func @transform_3(%arg0: i32, %arg1: i32, %arg2: i32) -> (i32, i32, i32) {
    %0 = arith.muli %arg2, %arg1 : i32
    %c0_i32 = arith.constant 0 : i32
    %c0_i32_0 = arith.constant 0 : i32
    return %0, %arg0, %c0_i32 : i32, i32, i32
  }
  func.func @transform_4(%arg0: i32, %arg1: i32, %arg2: i32) -> (i32, i32, i32) {
    %c0_i32 = arith.constant 0 : i32
    %c0_i32_0 = arith.constant 0 : i32
    %c0_i32_1 = arith.constant 0 : i32
    return %c0_i32, %arg0, %c0_i32_0 : i32, i32, i32
  }
  func.func @transform_5(%arg0: i32, %arg1: i32, %arg2: i32) -> (i32, i32, i32) {
    %c0_i32 = arith.constant 0 : i32
    %c0_i32_0 = arith.constant 0 : i32
    %c0_i32_1 = arith.constant 0 : i32
    return %c0_i32, %arg0, %c0_i32_0 : i32, i32, i32
  }
}

</mosaic_0001>

<bundles_post_ra>
// kernel: tpu_custom_call.1
= control target key start
LH: loop header
LB: loop body
LE: loop exit
PB: predicated region body
PF: predicated region fallthrough
CT: control target
= control target key end

     0   :  { %11 = vsyncpa [#allocation8], 0  ;;  %s955_s0 = inlined_call_operand.hbm [shape: f32[2,4,256], index: 0, kind: input, shape index: {}]   ;;  %s956_s1 = inlined_call_operand.vmem [shape: f32[1,4,1], index: 1, kind: input, shape index: {}]   ;;  %s957_s2 = inlined_call_operand.vmem [shape: f32[1,4,1], index: 2, kind: input, shape index: {}]   ;;  %s958_s3 = inlined_call_operand.hbm [shape: f32[2,4,256], index: 3, kind: output, shape index: {0}]   ;;  %s959_s4 = inlined_call_operand.vmem [shape: f32[1,4,1], index: 4, kind: output, shape index: {1}]   ;;  %s960_s5 = inlined_call_operand.vmem [shape: f32[1,4,1], index: 5, kind: output, shape index: {2}]  }
   0x1   :  { %12 = vsyncpa [#allocation9], 0 }
   0x2   :  { %14 = vsyncpa [#allocation9 + $0x1], 0  ;;  %s850_s18 = smov 0   ;;  %s852_s19 = smov 0  }
   0x3   :  { %s854_s20 = smov 0  }
   0x4 LB: > { %s649_s21 = sadd.s32 4294967295, %s807_s20   ;;  %s650_s22 = sadd.s32 4294967294, %s807_s20   ;;  %s807_s20 = sphi %s854_s20, %s20_s20   ;;  %s803_s19 = sphi %s852_s19, %s965_s19   ;;  %s799_s18 = sphi %s850_s18, %s964_s18  }
   0x5   : > { %s35_s23 = sadd.s32 1, %s803_s19  ;;  %p651_p0 = scmp.ge.s32.totalorder %s807_s20, 1 }
   0x6   : > { %p37_p1 = scmp.ge.s32.totalorder %s35_s23, 2  ;;  %p206_p2 = scmp.lt.s32.totalorder %s807_s20, 3 }
   0x7   : > { %p872_p3 = scmp.eq.s32.totalorder %s649_s21, 0  ;;  %s809_s26 = smov [#allocation7]  }
   0x8   : > { %s967_s23 = smov (%p37_p1, %s35_s23), 0  ;;  %p878_p4 = pnand %p651_p0, %p206_p2 }
   0x9   : > { %s224_s27 = sshll.u32 %s809_s26, 4  ;;  %s225_s27 = int_to_ptr.vmem [resolvable:$true] %s224_s27 }
   0xa   : > { %p673_p5 = pneg %p878_p4  ;;  %s738_s28 = scalar_lea.vmem %s225_s27, 256 }
   0xb   : > { %p739_p8 = scmp.ne.s32.totalorder %s225_s27, %s738_s28  ;;  %p746_p11 = scmp.lt.s32.totalorder %s225_s27, %s225_s27 }
   0xc   : > { %p674_p6 = pnand %p872_p3, %p673_p5  ;;  %p747_p12 = scmp.lt.s32.totalorder %s738_s28, %s738_s28 }
   0xe   : > { %p729_p7 = pneg %p674_p6  ;;  %p748_p13 = por %p747_p12, %p746_p11 }
  0x10   : > { %p741_p9 = pnand %p739_p8, %p729_p7 }
  0x12   : > { %p742_p10 = pneg %p741_p9 }
  0x14   : > { %p749_p0 = pnand %p748_p13, %p742_p10 }
  0x16   : > { %752 = shalt.err (!%p749_p0)
}
  0x17   : > { %s810_s29 = smov 128   ;;  %s811_s30 = smov 8  }
  0x18   : > { %676 = dma.hbm_to_vmem [thread:$0]  (!%p674_p6), %s955_s0, 256, %s225_s27, [#allocation8], %s810_s29, %s810_s29, %s811_s30  }
  0x19   : > { %254 = sbr.rel (%p878_p4) target bundleno = 672 (0x2a0), region = 32 }
  0x1e   : > { %790 = dma.done.wait (%p872_p3), [#allocation8], 256  }
  0x1f   : > { %792 = vsyncadd (%p872_p3), [#allocation8], 4294967040  ;;  %p657_p1 = scmp.ne.s32.totalorder %s799_s18, 0 }
  0x21   : > { %315 = sbr.rel (%p657_p1) target bundleno = 516 (0x204), region = 40 }
  0x26   : > { %v316_v0 = vld [vmem:[#allocation7] sm:$0xff]  ;;  %v317_v1 = vld [vmem:[#allocation7 + $0x8] sm:$0xff]  ;;  %vm328_vm0 = vcmask 1043456   ;;  %v812_v11 = vmov 0   ;;  %vm339_vm1 = vcmask 3072   ;;  %v813_v15 = vmov 0.0  }
  0x27   : > { %v324_v2 = vcombine.high %v316_v0, %v316_v0  ;;  %v325_v3 = vcombine.high %v317_v1, %v317_v1  ;;  %v329_v4 = vsel %vm328_vm0, %v316_v0, 0.0  ;;  %v332_v6 = vsel %vm328_vm0, %v317_v1, 0.0  ;;  %721 = vset.pattern.permute.xlu0 %v812_v11  ;;  %341 = vst.msk [vmem:[#allocation2] sm:$0xf] %vm339_vm1, %v813_v15  ;;  %342 = vst.msk [vmem:[#allocation3] sm:$0xf] %vm339_vm1, %v813_v15 }
  0x28   : > { %v814_v16 = vmov 839922192   ;;  %v351_v18 = vlaneseq }
  0x29   : > { %v330_v5 = vsel %vm328_vm0, %v324_v2, 0.0  ;;  %v334_v8 = vsel %vm328_vm0, %v325_v3, 0.0  ;;  %v349_v17 = vunpack.c.l.s4 %v814_v16  ;;  %v417_v3 = vld [vmem:[%s956_s1] sm:$0xf] }
  0x2a   : > { %v331_v7 = vadd.f32 %v330_v5, %v329_v4  ;;  %v352_v20 = vshrl.u32 %v351_v18, 7 }
  0x2b   : > { %v350_v19 = vunpack.c.0.s8 %v349_v17 }
  0x2c   : > { %v333_v9 = vadd.f32 %v332_v6, %v331_v7  ;;  %v419_v6 = vld [vmem:[%s957_s2] sm:$0xf] }
  0x2d   : > { %v353_v21 = vsub.s32 %v350_v19, %v352_v20 }
  0x2e   : > { %v335_v10 = vadd.f32 %v334_v8, %v333_v9  ;;  %v358_v46 = vld [vmem:[#allocation2] sm:$0xf]  ;;  %v378_v49 = vld [vmem:[#allocation3] sm:$0xf] }
  0x30   : > { %336 = vadd.xlane.f32.xlu0 %v335_v10 }
  0xb9   : > { %v337_v12 = vpop.xlane.xlu0 %336 }
  0xba   : > { %v338_v13 = vmul.f32 0.001953125, %v337_v12 }
  0xbc   : > { %340 = vst.msk [vmem:[#allocation4] sm:$0xf] %vm339_vm1, %v338_v13 }
  0xc3   : > { %v343_v14 = vld [vmem:[#allocation4] sm:$0xf] }
  0xc4   : > { %346 = vperm.xlu0 %721, %v343_v14   ;;  %v401_v52 = vld [vmem:[#allocation4] sm:$0xf] }
  0xc5   : > { %v403_v53 = vmul.f32 0.0, %v401_v52  ;;  %v406_v54 = vmul.f32 %v401_v52, %v401_v52 }
  0xc7   : > { %v407_v57 = vmul.f32 0.0, %v406_v54 }
 0x13f   : > { %v347_v22 = vpop.permute.xlu0 %346 }
 0x140   : > { %v354_v23 = vrot.slane %v347_v22, %v353_v21 }
 0x142   : > { %v356_v24 = vsub.f32 %v316_v0, %v354_v23  ;;  %v357_v25 = vsub.f32 %v317_v1, %v354_v23 }
 0x144   : > { %v379_v26 = vmul.f32 %v356_v24, %v356_v24  ;;  %v361_v27 = vcombine.high %v356_v24, %v356_v24  ;;  %v362_v28 = vcombine.high %v357_v25, %v357_v25  ;;  %v366_v29 = vsel %vm328_vm0, %v356_v24, 0.0 }
 0x145   : > { %v380_v31 = vmul.f32 %v357_v25, %v357_v25  ;;  %v369_v34 = vsel %vm328_vm0, %v357_v25, 0.0 }
 0x146   : > { %v367_v30 = vsel %vm328_vm0, %v361_v27, 0.0  ;;  %v383_v32 = vcombine.high %v379_v26, %v379_v26  ;;  %v387_v35 = vsel %vm328_vm0, %v379_v26, 0.0  ;;  %v371_v39 = vsel %vm328_vm0, %v362_v28, 0.0 }
 0x147   : > { %v368_v33 = vadd.f32 %v367_v30, %v366_v29  ;;  %v384_v40 = vcombine.high %v380_v31, %v380_v31  ;;  %v390_v41 = vsel %vm328_vm0, %v380_v31, 0.0 }
 0x148   : > { %v388_v36 = vsel %vm328_vm0, %v383_v32, 0.0 }
 0x149   : > { %v370_v37 = vadd.f32 %v369_v34, %v368_v33  ;;  %v389_v38 = vadd.f32 %v388_v36, %v387_v35  ;;  %v392_v44 = vsel %vm328_vm0, %v384_v40, 0.0 }
 0x14b   : > { %v372_v42 = vadd.f32 %v371_v39, %v370_v37  ;;  %v391_v43 = vadd.f32 %v390_v41, %v389_v38 }
 0x14d   : > { %373 = vadd.xlane.f32.xlu1 %v372_v42  ;;  %v393_v45 = vadd.f32 %v392_v44, %v391_v43 }
 0x151   : > { %394 = vadd.xlane.f32.xlu1 %v393_v45 }
 0x1d6   : > { %v374_v47 = vpop.xlane.xlu1 %373 }
 0x1d7   : > { %v375_v48 = vadd.f32 %v374_v47, %v358_v46 }
 0x1d9   : > { %377 = vst.msk [vmem:[#allocation2] sm:$0xf] %vm339_vm1, %v375_v48 }
 0x1da   : > { %v395_v50 = vpop.xlane.xlu1 %394 }
 0x1db   : > { %v396_v51 = vadd.f32 %v395_v50, %v378_v49 }
 0x1dd   : > { %397 = vst.msk [vmem:[#allocation3] sm:$0xf] %vm339_vm1, %v396_v51 }
 0x1e0   : > { %v402_v55 = vld [vmem:[#allocation2] sm:$0xf] }
 0x1e1   : > { %v404_v56 = vadd.f32 %v403_v53, %v402_v55 }
 0x1e3   : > { %v409_v58 = vmul.f32 0.001953125, %v404_v56 }
 0x1e4   : > { %v405_v59 = vld [vmem:[#allocation3] sm:$0xf] }
 0x1e5   : > { %v410_v60 = vadd.f32 %v409_v58, %v401_v52  ;;  %v408_v61 = vsub.f32 %v405_v59, %v407_v57  ;;  %v412_v62 = vmul.f32 %v409_v58, %v409_v58 }
 0x1e7   : > { %422 = vst.msk [vmem:[%s959_s4] sm:$0xf] %vm339_vm1, %v410_v60  ;;  %v411_v63 = vmul.f32 0.001953125, %v408_v61 }
 0x1e9   : > { %v413_v0 = vsub.f32 %v411_v63, %v412_v62 }
 0x1eb   : > { %v414_v1 = vmax.f32 %v413_v0, 0.0 }
 0x1ed   : > { %v415_v2 = vadd.f32 1e-05, %v414_v1  ;;  %423 = vst.msk [vmem:[%s960_s5] sm:$0xf] %vm339_vm1, %v414_v1 }
 0x1ef   : > { %724 = vrsqrt.f32 %v415_v2 }
 0x1fc   : > { %v725_v4 = vpop.eup %724 }
 0x1fd   : > { %v418_v5 = vmul.f32 %v725_v4, %v417_v3 }
 0x1ff   : > { %v420_v7 = vmul.f32 %v418_v5, %v410_v60  ;;  %424 = vst.msk [vmem:[#allocation5] sm:$0xf] %vm339_vm1, %v418_v5 }
 0x201   : > { %v421_v8 = vsub.f32 %v419_v6, %v420_v7 }
 0x203   : > { %425 = vst.msk [vmem:[#allocation6] sm:$0xf] %vm339_vm1, %v421_v8 }
 0x204 PF: > { %p658_p2 = scmp.ne.s32.totalorder %s799_s18, 1 }
 0x206   : > { %429 = sbr.rel (%p658_p2) target bundleno = 658 (0x292), region = 52 }
 0x20b   : > { %v432_v9 = vld [vmem:[#allocation5] sm:$0xf]  ;;  %v815_v10 = vmov 0   ;;  %v447_v11 = vld [vmem:[#allocation6] sm:$0xf]  ;;  %v440_v14 = vlaneseq  ;;  %v430_v20 = vld [vmem:[#allocation7] sm:$0xff] }
 0x20c   : > { %726 = vset.pattern.permute.xlu0 %v815_v10  ;;  %v816_v12 = vmov 839922192   ;;  %v431_v21 = vld [vmem:[#allocation7 + $0x8] sm:$0xff] }
 0x20d   : > { %435 = vperm.xlu0 %726, %v432_v9   ;;  %v438_v13 = vunpack.c.l.s4 %v816_v12  ;;  %v441_v16 = vshrl.u32 %v440_v14, 7 }
 0x20f   : > { %v439_v15 = vunpack.c.0.s8 %v438_v13 }
 0x211   : > { %450 = vperm.xlu0 %726, %v447_v11   ;;  %v442_v17 = vsub.s32 %v439_v15, %v441_v16 }
 0x288   : > { %v436_v18 = vpop.permute.xlu0 %435 }
 0x289   : > { %v443_v19 = vrot.slane %v436_v18, %v442_v17 }
 0x28b   : > { %v445_v23 = vmul.f32 %v443_v19, %v430_v20  ;;  %v446_v24 = vmul.f32 %v443_v19, %v431_v21 }
 0x28c   : > { %v451_v22 = vpop.permute.xlu0 %450 }
 0x28d   : > { %v458_v25 = vrot.slane %v451_v22, %v442_v17 }
 0x28f   : > { %v460_v26 = vadd.f32 %v458_v25, %v445_v23  ;;  %v461_v27 = vadd.f32 %v458_v25, %v446_v24 }
 0x291   : > { %462 = vst [vmem:[#allocation10] sm:$0xff] %v460_v26  ;;  %463 = vst [vmem:[#allocation10 + $0x8] sm:$0xff] %v461_v27 }
 0x292 PF: > { %p932_p3 = scmp.eq.s32.totalorder %s649_s21, 1  ;;  %s817_s17 = smov [#allocation10]  }
 0x293   : > { %s490_s18 = sshll.u32 %s817_s17, 4  ;;  %s491_s18 = int_to_ptr.vmem [resolvable:$true] %s490_s18 }
 0x294   : > { %s753_s24 = scalar_lea.vmem %s491_s18, 256  ;;  %s759_s25 = scalar_lea.vmem %s491_s18, 512 }
 0x295   : > { %p754_p4 = scmp.ne.s32.totalorder %s491_s18, %s753_s24  ;;  %p760_p7 = scmp.lt.s32.totalorder %s491_s18, %s491_s18 }
 0x296   : > { %p761_p8 = scmp.lt.s32.totalorder %s759_s25, %s753_s24 }
 0x297   : > { %p755_p5 = pnand %p754_p4, %p932_p3 }
 0x298   : > { %p762_p9 = por %p761_p8, %p760_p7 }
 0x299   : > { %p756_p6 = pneg %p755_p5 }
 0x29b   : > { %p763_p10 = pnand %p762_p9, %p756_p6 }
 0x29d   : > { %766 = shalt.err (!%p763_p10)
}
 0x29e   : > { %s818_s26 = smov 128   ;;  %s819_s21 = smov 8  }
 0x29f   : > { %670 = dma.vmem_to_hbm [thread:$0]  (%p932_p3), %s491_s18, 256, %s958_s3, [#allocation9], %s818_s26, %s818_s26, %s819_s21  }
 0x2a0 PF: > { %p684_p11 = scmp.ge.s32.totalorder %s807_s20, 2  ;;  %p685_p12 = scmp.eq.s32.totalorder %s650_s22, 1 }
 0x2a2   : > { %p678_p13 = pnand %p685_p12, %p684_p11 }
 0x2a4   : > { %p679_p0 = pneg %p678_p13 }
 0x2a6   : > { %794 = dma.done.wait (%p679_p0), [#allocation9], 256  }
 0x2a7   : > { %796 = vsyncadd (%p679_p0), [#allocation9], 4294967040  ;;  %s20_s20 = sadd.s32 1, %s807_s20   ;;  %s964_s18 = smov %s803_s19 }
 0x2a8   : > { %p17_p1 = scmp.ge.s32.totalorder %s20_s20, 4   ;;  %s965_s19 = smov %s967_s23 }
 0x2aa   :  { %19 = sbr.rel (!%p17_p1) target bundleno = 4 (0x4), region = 116 }
 0x2af   :  { %531 = vsyncpa [#allocation8], 1 }
 0x2b0   :  { %533 = vsyncpa [#allocation8 + $0x1], 1 }
 0x2b1   :  { %534 = vsyncpa [#allocation9], 1 }
 0x2b2   :  { %536 = vsyncpa [#allocation9 + $0x1], 1 }

</bundles_post_ra>
